<compile_context>
chip_gen: v7x
topology: tpu7x:2x2x1
jax: 0.10.0
libtpu: 0.0.40
codegen_flags: <defaults>
</compile_context>

<pallas_src>
import functools
import math

import jax
import jax.numpy as jnp
from jax.experimental import pallas as pl
from jax.experimental.pallas import tpu as pltpu

_COLS = 2048        # lane-dense tile width (multiple of 128)
_ROW_TILE = 512     # 512 x 2048 f32 = 4 MiB blocks -> ~HBM roofline
_MIB = 1024 * 1024


def _vmem_capacity_bytes():
    """Physical VMEM of the local TPU; conservative 64 MiB if unknown."""
    try:
        cap = getattr(pltpu.get_tpu_info(), "vmem_capacity_bytes", None)
        if cap:
            return int(cap)
    except Exception:
        pass
    return 64 * _MIB


# ----------------------------------------------------------------------------
# Kernels
# ----------------------------------------------------------------------------
def _fused_rescale_kernel(x_ref, o_ref):
    """Whole array resident in VMEM: global max + scale in one pass.
    Max is computed in the input dtype (exact); no f32 copy is materialised."""
    x = x_ref[...]
    m = jnp.max(x).astype(jnp.float32)
    scale = jnp.float32(255.0) / m
    o_ref[...] = (x * scale.astype(x.dtype)).astype(o_ref.dtype)


def _partial_max_kernel(x_ref, pmax_ref, *, rows, row_tile, ragged):
    """Per-tile partial max written to a disjoint (8,128) block (parallel grid).
    The ragged last tile is masked with -inf so out-of-bounds garbage cannot
    pollute the max."""
    xf = x_ref[...].astype(jnp.float32)
    if ragged:
        i = pl.program_id(0)
        ridx = jax.lax.broadcasted_iota(jnp.int32, xf.shape, 0)
        xf = jnp.where(i * row_tile + ridx < rows, xf, -jnp.inf)
    m = jnp.max(xf)
    pmax_ref[...] = jnp.full(pmax_ref.shape, m, dtype=pmax_ref.dtype)


def _scale_kernel(scale_ref, x_ref, o_ref):
    """Elementwise o = x * (255/max); scale_ref is a (1,1) f32 SMEM scalar.
    Multiply is done in the input dtype (f32 stays f32; bf16 stays bf16).
    Out-of-bounds rows of a ragged last tile are dropped by Pallas."""
    s = scale_ref[0, 0]
    x = x_ref[...]
    o_ref[...] = (x * s.astype(x.dtype)).astype(o_ref.dtype)


# ----------------------------------------------------------------------------
# Wrapper
# ----------------------------------------------------------------------------
def rescale(x, *, max_fused_bytes=None, _row_tile=None):
    """x: float array of any shape (e.g. NCHW). Returns x / x.max() * 255.

    max_fused_bytes: override for the single-pass/two-pass threshold
      (None -> generation-aware default).
    _row_tile: test hook; if given must be a multiple of 8 (or >= rows).
    """
    orig_shape = x.shape
    orig_dtype = x.dtype
    total = math.prod(orig_shape)
    nbytes = total * jnp.dtype(orig_dtype).itemsize

    vmem_cap = _vmem_capacity_bytes()
    vmem_limit = int(max(32 * _MIB, min(vmem_cap * 3 // 4, vmem_cap - 8 * _MIB)))
    if max_fused_bytes is None:
        # v5e/v6e (128 MiB VMEM): fuse up to 32 MiB -> saves a full HBM read.
        # v7x (64 MiB VMEM): keep the gridless single-TC fused path small.
        max_fused_bytes = 32 * _MIB if vmem_cap >= 100 * _MIB else 12 * _MIB

    # ---- Fused single-pass path (whole array resident in VMEM) -------------
    if nbytes <= max_fused_bytes:
        cols = None
        for c in (2048, 1024, 512, 256, 128):        # prefer sublane-dense too
            if total % c == 0 and total // c >= 8:
                cols = c
                break
        if cols is None:
            for c in (2048, 1024, 512, 256, 128):
                if total % c == 0:
                    cols = c
                    break
        padded = total
        if cols is None:
            # Awkward size (not a multiple of 128): array is small, so a cheap
            # pad to a sublane+lane-dense (rows, 1024) layout is fine.
            cols = 1024
            padded = ((total + cols - 1) // cols) * cols
            flat = jnp.pad(x.reshape(total), (0, padded - total),
                           constant_values=float(jnp.finfo(orig_dtype).min))
            x2d = flat.reshape(padded // cols, cols)
        else:
            x2d = x.reshape(total // cols, cols)

        y2d = pl.pallas_call(
            _fused_rescale_kernel,
            out_shape=jax.ShapeDtypeStruct(x2d.shape, orig_dtype),
            compiler_params=pltpu.CompilerParams(vmem_limit_bytes=vmem_limit),
        )(x2d)
        y = y2d.reshape(padded)
        if padded != total:
            y = y[:total]
        return y.reshape(orig_shape).astype(orig_dtype)

    # ---- Two-pass path (large inputs) ---------------------------------------
    flat = x.reshape(total)                  # copy-free for contiguous inputs
    cols = None
    for c in (_COLS, 1024, 512, 256, 128):
        if total % c == 0:
            cols = c
            break
    n_elems = total
    if cols is None:
        # Rare fallback: element count is not a multiple of 128.
        # TODO(synk): handle the <128-element ragged lane tail in-kernel to
        # avoid this full-array pad copy.
        cols = 1024
        n_elems = ((total + cols - 1) // cols) * cols
        flat = jnp.pad(flat, (0, n_elems - total),
                       constant_values=float(jnp.finfo(orig_dtype).min))

    rows = n_elems // cols
    x2d = flat.reshape(rows, cols)

    row_tile = _row_tile if _row_tile is not None else _ROW_TILE
    if rows <= row_tile:
        row_tile = rows                      # one block (full-dim) is fine
    nt = pl.cdiv(rows, row_tile)
    ragged = (rows % row_tile) != 0

    # Pass 1: parallel per-tile partial maxes (both TCs on v7x), tiny XLA
    # reduction of the (8, 128*nt) partials slab afterwards.
    pmax_kernel = functools.partial(_partial_max_kernel, rows=rows,
                                    row_tile=row_tile, ragged=ragged)
    partials = pl.pallas_call(
        pmax_kernel,
        out_shape=jax.ShapeDtypeStruct((8, 128 * nt), jnp.float32),
        grid_spec=pltpu.PrefetchScalarGridSpec(
            num_scalar_prefetch=0,
            grid=(nt,),
            in_specs=[pl.BlockSpec((row_tile, cols), lambda i: (i, 0))],
            out_specs=pl.BlockSpec((8, 128), lambda i: (0, i)),
        ),
        compiler_params=pltpu.CompilerParams(
            dimension_semantics=("parallel",),
            vmem_limit_bytes=vmem_limit,
        ),
    )(x2d)

    gmax = jnp.max(partials)
    scale = (jnp.float32(255.0) / gmax).reshape(1, 1)   # exact scalar 255/max

    # Pass 2: parallel elementwise multiply by the precomputed scale.
    y2d = pl.pallas_call(
        _scale_kernel,
        out_shape=jax.ShapeDtypeStruct((rows, cols), orig_dtype),
        grid_spec=pltpu.PrefetchScalarGridSpec(
            num_scalar_prefetch=0,
            grid=(nt,),
            in_specs=[
                pl.BlockSpec(memory_space=pltpu.SMEM),          # (1,1) scale
                pl.BlockSpec((row_tile, cols), lambda i: (i, 0)),
            ],
            out_specs=pl.BlockSpec((row_tile, cols), lambda i: (i, 0)),
        ),
        compiler_params=pltpu.CompilerParams(
            dimension_semantics=("parallel",),
            vmem_limit_bytes=vmem_limit,
        ),
    )(scale, x2d)

    y = y2d.reshape(n_elems)
    if n_elems != total:
        y = y[:total]
    return y.reshape(orig_shape).astype(orig_dtype)


# ----------------------------------------------------------------------------
# Test
# ----------------------------------------------------------------------------
if __name__ == "__main__":
    root = jax.random.PRNGKey(0)
    k1, k2, k3 = jax.random.split(root, 3)

    def ref(a):
        return (a / jnp.max(a)) * 255.0

    # 1) Small NCHW input -> fused single-pass path.
    x1 = jax.random.uniform(k1, (2, 4, 16, 16), dtype=jnp.float32,
                            minval=0.0, maxval=10.0)
    y1 = jax.block_until_ready(rescale(x1))
    assert y1.shape == x1.shape and y1.dtype == x1.dtype
    assert jnp.allclose(y1, ref(x1), rtol=1e-5, atol=1e-4), "fused path mismatch"

    # 2) Two-pass path, evenly tiled (forced via threshold=0).
    x2 = jax.random.uniform(k2, (2, 3, 64, 64), dtype=jnp.float32,
                            minval=0.0, maxval=10.0)
    y2 = jax.block_until_ready(rescale(x2, max_fused_bytes=0))
    assert y2.shape == x2.shape and y2.dtype == x2.dtype
    assert jnp.allclose(y2, ref(x2), rtol=1e-5, atol=1e-4), "two-pass mismatch"

    # 3) Two-pass path with a ragged last row-tile (exercises the in-kernel
    #    -inf mask + out-of-bounds output-write clipping) at small scale.
    x3 = jax.random.uniform(k3, (2, 4, 64, 96), dtype=jnp.float32,
                            minval=0.0, maxval=10.0)
    y3 = jax.block_until_ready(rescale(x3, max_fused_bytes=0, _row_tile=16))
    assert y3.shape == x3.shape and y3.dtype == x3.dtype
    assert jnp.allclose(y3, ref(x3), rtol=1e-5, atol=1e-4), "ragged two-pass mismatch"

    print("KERNEL_OK")
</pallas_src>

<mosaic_0001>
module attributes {stable_mosaic.version = 11 : i64} {
  func.func @_fused_rescale_kernel(%arg0: memref<8x256xf32, #tpu.memory_space<vmem>>, %arg1: memref<8x256xf32, #tpu.memory_space<vmem>>) attributes {dimension_semantics = [], scalar_prefetch = 0 : i64, scratch_operands = 0 : i64, tpu.core_type = #tpu.core_type<tc>} {
    %c0 = arith.constant 0 : index
    %c0_0 = arith.constant 0 : index
    %0 = vector.load %arg0[%c0, %c0_0] : memref<8x256xf32, #tpu.memory_space<vmem>>, vector<8x256xf32>
    %1 = vector.shape_cast %0 : vector<8x256xf32> to vector<1x8x256xf32>
    %cst = arith.constant dense<0xFF800000> : vector<1xf32>
    %2 = vector.multi_reduction <maximumf>, %1, %cst [1, 2] : vector<1x8x256xf32> to vector<1xf32>
    %3 = vector.shape_cast %2 : vector<1xf32> to vector<1x1x1xf32>
    %4 = vector.extract %3[0, 0, 0] : f32 from vector<1x1x1xf32>
    %cst_1 = arith.constant 2.550000e+02 : f32
    %5 = arith.divf %cst_1, %4 : f32
    %6 = vector.broadcast %5 : f32 to vector<8x256xf32>
    %7 = arith.mulf %0, %6 : vector<8x256xf32>
    %c0_2 = arith.constant 0 : index
    %c0_3 = arith.constant 0 : index
    %8 = vector.load %arg1[%c0_2, %c0_3] : memref<8x256xf32, #tpu.memory_space<vmem>>, vector<8x256xf32>
    tpu.vector_store %arg1[%c0_2, %c0_3], %7 {strides = array<i32>} : memref<8x256xf32, #tpu.memory_space<vmem>>, vector<8x256xf32>,
    return
  }
}

</mosaic_0001>

<bundles_post_ra>
// kernel: tpu_custom_call.1
= control target key start
LH: loop header
LB: loop body
LE: loop exit
PB: predicated region body
PF: predicated region fallthrough
CT: control target
= control target key end

     0   :  { %6 = vsyncpa [#allocation3], 0  ;;  %s149_s0 = inlined_call_operand.hbm [shape: f32[8,256], index: 0, kind: input, shape index: {}]   ;;  %s150_s1 = inlined_call_operand.hbm [shape: f32[8,256], index: 1, kind: output, shape index: {}]  }
   0x1   :  { %7 = vsyncpa [#allocation4], 0  ;;  %s113_s6 = smov [#allocation2]   ;;  %s65_s10 = scalar_lea.hbm %s149_s0, 256 }
   0x2   :  { %s14_s7 = sshll.u32 %s113_s6, 4  ;;  %p66_p0 = scmp.ne.s32.totalorder %s149_s0, %s65_s10  ;;  %s15_s7 = int_to_ptr.vmem [resolvable:$true] %s14_s7 }
   0x3   :  { %p69_p1 = scmp.lt.u32.totalorder %s65_s10, %s149_s0 }
   0x5   :  { %p71_p2 = pnand %p69_p1, %p66_p0 }
   0x7   :  { %74 = shalt.err (!%p71_p2)
}
   0x8   :  { %s75_s15 = scalar_lea.vmem %s15_s7, 256  ;;  %p80_p4 = scmp.lt.s32.totalorder %s15_s7, %s15_s7 }
   0x9   :  { %p76_p3 = scmp.ne.s32.totalorder %s15_s7, %s75_s15  ;;  %p81_p5 = scmp.lt.s32.totalorder %s75_s15, %s75_s15 }
   0xb   :  { %p82_p6 = por %p81_p5, %p80_p4 }
   0xd   :  { %p83_p7 = pnand %p82_p6, %p76_p3 }
   0xf   :  { %86 = shalt.err (!%p83_p7)
}
  0x10   :  { %17 = dma.hbm_to_vmem [thread:$0]  %s149_s0, 256, %s15_s7, [#allocation3]  }
  0x11   :  { %109 = dma.done.wait [#allocation3], 256  }
  0x12   :  { %110 = vsyncadd [#allocation3], 4294967040  ;;  %v21_v0 = vld [vmem:[#allocation2] sm:$0xff]  ;;  %v22_v1 = vld [vmem:[#allocation2 + $0x8] sm:$0xff]  ;;  %s114_s20 = smov [#allocation5]  }
  0x13   :  { %v23_v2 = vmax.f32 %v21_v0, %v22_v1  ;;  %s48_s21 = sshll.u32 %s114_s20, 4  ;;  %s49_s21 = int_to_ptr.vmem [resolvable:$true] %s48_s21 }
  0x14   :  { %s87_s22 = scalar_lea.vmem %s49_s21, 256  ;;  %p92_p9 = scmp.lt.s32.totalorder %s49_s21, %s49_s21 }
  0x15   :  { %24 = vmax.xlane.f32.xlu0 %v23_v2  ;;  %p88_p8 = scmp.ne.s32.totalorder %s49_s21, %s87_s22  ;;  %p93_p10 = scmp.lt.s32.totalorder %s87_s22, %s87_s22 }
  0x17   :  { %p94_p11 = por %p93_p10, %p92_p9 }
  0x19   :  { %p95_p12 = pnand %p94_p11, %p88_p8 }
  0xa2   :  { %v25_v3 = vpop.xlane.xlu0 %24 }
  0xa3   :  { %v26_v4 = vrot.slane %v25_v3, 4 }
  0xa5   :  { %v27_v5 = vmax.f32 %v25_v3, %v26_v4 }
  0xa7   :  { %v28_v6 = vrot.slane %v27_v5, 2 }
  0xa9   :  { %v29_v7 = vmax.f32 %v27_v5, %v28_v6 }
  0xab   :  { %v30_v8 = vrot.slane %v29_v7, 1 }
  0xad   :  { %v31_v9 = vmax.f32 %v29_v7, %v30_v8 }
  0xaf   :  { %57 = vpush %v31_v9 }
  0xe0   :  { %s58_s18 = spop %57 }
  0xe1   :  { %v33_v10 = vstv %s58_s18 }
  0xe2   :  { %63 = vrcp.f32 %v33_v10 }
  0xec   :  { %v64_v11 = vpop.eup %63 }
  0xed   :  { %59 = vpush %v64_v11 }
 0x11e   :  { %s60_s0 = spop %59 }
 0x11f   :  { %s36_s19 = smul.f32 255.0, %s60_s0 }
 0x121   :  { %v37_v12 = vstv %s36_s19 }
 0x122   :  { %v38_v13 = vmul.f32 %v37_v12, %v21_v0  ;;  %v39_v14 = vmul.f32 %v37_v12, %v22_v1 }
 0x124   :  { %40 = vst [vmem:[#allocation5] sm:$0xff] %v38_v13  ;;  %41 = vst [vmem:[#allocation5 + $0x8] sm:$0xff] %v39_v14 }
 0x125   :  { %98 = shalt.err (!%p95_p12)
}
 0x126   :  { %s99_s25 = scalar_lea.hbm %s150_s1, 256 }
 0x127   :  { %p100_p13 = scmp.ne.s32.totalorder %s150_s1, %s99_s25  ;;  %p103_p0 = scmp.lt.u32.totalorder %s99_s25, %s150_s1 }
 0x129   :  { %p105_p1 = pnand %p103_p0, %p100_p13 }
 0x12b   :  { %108 = shalt.err (!%p105_p1)
}
 0x12c   :  { %51 = dma.vmem_to_hbm [thread:$0]  %s49_s21, 256, %s150_s1, [#allocation4]  }
 0x12d   :  { %111 = dma.done.wait [#allocation4], 256  }
 0x12e   :  { %112 = vsyncadd [#allocation4], 4294967040 }
 0x12f   :  { %55 = vsyncpa [#allocation3], 1 }
 0x130   :  { %56 = vsyncpa [#allocation4], 1 }

</bundles_post_ra>
